<compile_context>
chip_gen: v7x
topology: tpu7x:2x2x1
jax: 0.10.0
libtpu: 0.0.40
codegen_flags: <defaults>
</compile_context>

<pallas_src>
import functools

import jax
import jax.numpy as jnp
from jax.experimental import pallas as pl
from jax.experimental.pallas import tpu as pltpu

LANE = 128  # TPU lane width; output dim is padded to a multiple of this.


def dnn_kernel(x_ref, w1_ref, b1_ref, w2_ref, b2_ref, o_ref):
    # fc1: cast x to bf16 in-kernel (VPU, one vreg), bf16 MXU operands,
    # f32 accumulation.
    x_bf = x_ref[...].astype(jnp.bfloat16)
    h = jnp.dot(x_bf, w1_ref[...], preferred_element_type=jnp.float32)
    # Bias + ReLU in f32 on the VPU (keep elementwise math f32 for v5e).
    h = jnp.maximum(h + b1_ref[...], 0.0)
    # fc2: cast activations to bf16 only as MXU operand; accumulate in f32.
    out = jnp.dot(h.astype(w2_ref.dtype), w2_ref[...],
                  preferred_element_type=jnp.float32)
    # Lane-dense [B, 128] store (unmasked vst); real outputs are lanes [:D_out].
    o_ref[...] = (out + b2_ref[...]).astype(o_ref.dtype)


def prepare_params(w1, b1, w2, b2):
    """One-time parameter preparation (call at init, NOT per forward).

    w1: [D_in, H], b1: [1, H], w2: [H, D_out], b2: [1, D_out]
    (pre-transposed relative to nn.Linear, so y = relu(x@w1+b1) @ w2 + b2).

    Returns (w1_bf16, b1_f32, w2_padded_bf16[H,128k], b2_padded_f32[1,128k], d_out).
    """
    H, d_out = w2.shape
    n_pad = ((d_out + LANE - 1) // LANE) * LANE

    w1_bf = w1.astype(jnp.bfloat16)
    b1_f = b1.astype(jnp.float32)
    # Zero-pad the output dimension to a full lane width (done once).
    w2_p = jnp.zeros((H, n_pad), jnp.bfloat16).at[:, :d_out].set(
        w2.astype(jnp.bfloat16))
    b2_p = jnp.zeros((1, n_pad), jnp.float32).at[:, :d_out].set(
        b2.astype(jnp.float32))
    return w1_bf, b1_f, w2_p, b2_p, d_out


def dnn_forward_padded(x, w1_bf, b1_f, w2_p, b2_p):
    """Runs the kernel and returns the lane-padded [B, 128k] f32 output."""
    B, d_in = x.shape
    H, n_pad = w2_p.shape

    cost = pl.CostEstimate(
        flops=2 * B * (d_in * H + H * n_pad),
        transcendentals=0,
        bytes_accessed=(x.size * 4 + w1_bf.size * 2 + b1_f.size * 4
                        + w2_p.size * 2 + b2_p.size * 4 + B * n_pad * 4),
    )

    vmem = lambda: pl.BlockSpec(memory_space=pltpu.MemorySpace.VMEM)
    return pl.pallas_call(
        dnn_kernel,
        out_shape=jax.ShapeDtypeStruct((B, n_pad), jnp.float32),
        in_specs=[vmem(), vmem(), vmem(), vmem(), vmem()],
        out_specs=vmem(),
        cost_estimate=cost,
    )(x, w1_bf, b1_f, w2_p, b2_p)


@functools.partial(jax.jit, static_argnames=("d_out",))
def dnn_forward(x, w1_bf, b1_f, w2_p, b2_p, d_out):
    """Jit'd forward: kernel + epilogue slice fused in one dispatch."""
    return dnn_forward_padded(x, w1_bf, b1_f, w2_p, b2_p)[:, :d_out]


def init_params(key, input_size, hidden_size, output_size):
    # Deterministic init mimicking nn.Linear's uniform(-1/sqrt(fan_in), +).
    k1, k2, k3, k4 = jax.random.split(key, 4)
    bound1 = 1.0 / jnp.sqrt(jnp.float32(input_size))
    bound2 = 1.0 / jnp.sqrt(jnp.float32(hidden_size))
    w1 = jax.random.uniform(k1, (input_size, hidden_size), jnp.float32,
                            minval=-bound1, maxval=bound1)
    b1 = jax.random.uniform(k2, (1, hidden_size), jnp.float32,
                            minval=-bound1, maxval=bound1)
    w2 = jax.random.uniform(k3, (hidden_size, output_size), jnp.float32,
                            minval=-bound2, maxval=bound2)
    b2 = jax.random.uniform(k4, (1, output_size), jnp.float32,
                            minval=-bound2, maxval=bound2)
    return w1, b1, w2, b2


if __name__ == "__main__":
    # UWB 2D positioning: a handful of anchor-distance features in,
    # 2-D coordinate out. hidden_size follows the module (128).
    batch = 8
    input_size = 8
    hidden_size = 128
    output_size = 2

    key = jax.random.PRNGKey(0)
    kx, kp = jax.random.split(key)
    x = jax.random.normal(kx, (batch, input_size), jnp.float32)
    w1, b1, w2, b2 = init_params(kp, input_size, hidden_size, output_size)

    # One-time parameter prep (hoisted out of the per-call path).
    w1_bf, b1_f, w2_p, b2_p, d_out = prepare_params(w1, b1, w2, b2)
    w1_bf, b1_f, w2_p, b2_p = jax.block_until_ready((w1_bf, b1_f, w2_p, b2_p))

    out = dnn_forward(x, w1_bf, b1_f, w2_p, b2_p, d_out)
    out = jax.block_until_ready(out)
    assert out.shape == (batch, output_size)

    # Reference matching the kernel's bf16-operand / f32-accumulate path.
    x_bf = x.astype(jnp.bfloat16)
    h_ref = jnp.maximum(
        jnp.dot(x_bf, w1.astype(jnp.bfloat16),
                preferred_element_type=jnp.float32) + b1, 0.0)
    ref_bf = jnp.dot(h_ref.astype(jnp.bfloat16), w2.astype(jnp.bfloat16),
                     preferred_element_type=jnp.float32) + b2
    assert jnp.allclose(out, ref_bf, atol=1e-3, rtol=1e-3)

    # Looser sanity check against the pure-f32 PyTorch-equivalent math.
    ref_f32 = jnp.maximum(x @ w1 + b1, 0.0) @ w2 + b2
    assert jnp.allclose(out, ref_f32, atol=5e-2, rtol=5e-2)

    print("KERNEL_OK")
</pallas_src>

<mosaic_0001>
module attributes {stable_mosaic.version = 11 : i64} {
  func.func @dnn_kernel(%arg0: memref<8x8xf32, #tpu.memory_space<vmem>>, %arg1: memref<8x128xbf16, #tpu.memory_space<vmem>>, %arg2: memref<1x128xf32, #tpu.memory_space<vmem>>, %arg3: memref<128x128xbf16, #tpu.memory_space<vmem>>, %arg4: memref<1x128xf32, #tpu.memory_space<vmem>>, %arg5: memref<8x128xf32, #tpu.memory_space<vmem>>) attributes {dimension_semantics = [], scalar_prefetch = 0 : i64, scratch_operands = 0 : i64, tpu.core_type = #tpu.core_type<tc>} {
    %c0 = arith.constant 0 : index
    %c0_0 = arith.constant 0 : index
    %0 = vector.load %arg0[%c0, %c0_0] : memref<8x8xf32, #tpu.memory_space<vmem>>, vector<8x8xf32>
    %1 = arith.truncf %0 : vector<8x8xf32> to vector<8x8xbf16>
    %c0_1 = arith.constant 0 : index
    %c0_2 = arith.constant 0 : index
    %2 = vector.load %arg1[%c0_1, %c0_2] : memref<8x128xbf16, #tpu.memory_space<vmem>>, vector<8x128xbf16>
    %cst = arith.constant dense<0.000000e+00> : vector<8x128xf32>
    %3 = tpu.matmul %1, %2, %cst {dimension_numbers = #tpu.dot_dimension_numbers<[1], [0], [0], [1], [0, 0, 1, 1], [], []>} : vector<8x8xbf16>, vector<8x128xbf16>, vector<8x128xf32> -> vector<8x128xf32>
    %c0_3 = arith.constant 0 : index
    %c0_4 = arith.constant 0 : index
    %4 = vector.load %arg2[%c0_3, %c0_4] : memref<1x128xf32, #tpu.memory_space<vmem>>, vector<1x128xf32>
    %5 = vector.broadcast %4 : vector<1x128xf32> to vector<8x128xf32>
    %6 = arith.addf %3, %5 : vector<8x128xf32>
    %cst_5 = arith.constant 0.000000e+00 : f32
    %7 = vector.broadcast %cst_5 : f32 to vector<8x128xf32>
    %8 = arith.maximumf %6, %7 : vector<8x128xf32>
    %9 = arith.truncf %8 : vector<8x128xf32> to vector<8x128xbf16>
    %c0_6 = arith.constant 0 : index
    %c0_7 = arith.constant 0 : index
    %10 = vector.load %arg3[%c0_6, %c0_7] : memref<128x128xbf16, #tpu.memory_space<vmem>>, vector<128x128xbf16>
    %cst_8 = arith.constant dense<0.000000e+00> : vector<8x128xf32>
    %11 = tpu.matmul %9, %10, %cst_8 {dimension_numbers = #tpu.dot_dimension_numbers<[1], [0], [0], [1], [0, 0, 1, 1], [], []>} : vector<8x128xbf16>, vector<128x128xbf16>, vector<8x128xf32> -> vector<8x128xf32>
    %c0_9 = arith.constant 0 : index
    %c0_10 = arith.constant 0 : index
    %12 = vector.load %arg4[%c0_9, %c0_10] : memref<1x128xf32, #tpu.memory_space<vmem>>, vector<1x128xf32>
    %13 = vector.broadcast %12 : vector<1x128xf32> to vector<8x128xf32>
    %14 = arith.addf %11, %13 : vector<8x128xf32>
    %c0_11 = arith.constant 0 : index
    %c0_12 = arith.constant 0 : index
    %15 = vector.load %arg5[%c0_11, %c0_12] : memref<8x128xf32, #tpu.memory_space<vmem>>, vector<8x128xf32>
    tpu.vector_store %arg5[%c0_11, %c0_12], %14 {strides = array<i32>} : memref<8x128xf32, #tpu.memory_space<vmem>>, vector<8x128xf32>,
    return
  }
}

</mosaic_0001>

<bundles_post_ra>
// kernel: dnn_forward.1
= control target key start
LH: loop header
LB: loop body
LE: loop exit
PB: predicated region body
PF: predicated region fallthrough
CT: control target
= control target key end

     0   :  { %10 = vsyncpa [#allocation3], 0  ;;  %s451_s0 = inlined_call_operand.hbm [shape: f32[8,8], index: 0, kind: input, shape index: {}]   ;;  %s452_s1 = inlined_call_operand.hbm [shape: bf16[8,128], index: 1, kind: input, shape index: {}]   ;;  %s453_s2 = inlined_call_operand.vmem [shape: f32[1,128], index: 2, kind: input, shape index: {}]   ;;  %s454_s3 = inlined_call_operand.hbm [shape: bf16[128,128], index: 3, kind: input, shape index: {}]   ;;  %s455_s4 = inlined_call_operand.vmem [shape: f32[1,128], index: 4, kind: input, shape index: {}]   ;;  %s456_s5 = inlined_call_operand.vmem [shape: f32[8,128], index: 5, kind: output, shape index: {}]  }
   0x1   :  { %11 = vsyncpa [#allocation5], 0  ;;  %s369_s18 = smov [#allocation4]   ;;  %s370_s20 = smov [#allocation2]  }
   0x2   :  { %s28_s19 = sshll.u32 %s369_s18, 4  ;;  %s18_s21 = sshll.u32 %s370_s20, 4  ;;  %s29_s19 = int_to_ptr.vmem [resolvable:$true] %s28_s19  ;;  %s19_s21 = int_to_ptr.vmem [resolvable:$true] %s18_s21 }
   0x3   :  { %s299_s24 = scalar_lea.hbm %s452_s1, 64 }
   0x4   :  { %p300_p0 = scmp.ne.s32.totalorder %s452_s1, %s299_s24  ;;  %p303_p1 = scmp.lt.u32.totalorder %s299_s24, %s452_s1 }
   0x6   :  { %p305_p2 = pnand %p303_p1, %p300_p0 }
   0x8   :  { %308 = shalt.err (!%p305_p2)
}
   0x9   :  { %s309_s29 = scalar_lea.vmem %s29_s19, 64  ;;  %p314_p4 = scmp.lt.s32.totalorder %s29_s19, %s29_s19 }
   0xa   :  { %p310_p3 = scmp.ne.s32.totalorder %s29_s19, %s309_s29  ;;  %p315_p5 = scmp.lt.s32.totalorder %s309_s29, %s309_s29 }
   0xc   :  { %p316_p6 = por %p315_p5, %p314_p4 }
   0xe   :  { %p317_p7 = pnand %p316_p6, %p310_p3 }
  0x10   :  { %320 = shalt.err (!%p317_p7)
}
  0x11   :  { %31 = dma.hbm_to_vmem [thread:$0]  %s452_s1, 64, %s29_s19, [#allocation5]  }
  0x12   :  { %s321_s9 = scalar_lea.hbm %s451_s0, 128 }
  0x13   :  { %p322_p8 = scmp.ne.s32.totalorder %s451_s0, %s321_s9  ;;  %p325_p9 = scmp.lt.u32.totalorder %s321_s9, %s451_s0 }
  0x15   :  { %p327_p10 = pnand %p325_p9, %p322_p8 }
  0x17   :  { %330 = shalt.err (!%p327_p10)
}
  0x18   :  { %s331_s14 = scalar_lea.vmem %s19_s21, 128  ;;  %p336_p12 = scmp.lt.s32.totalorder %s19_s21, %s19_s21 }
  0x19   :  { %p332_p11 = scmp.ne.s32.totalorder %s19_s21, %s331_s14  ;;  %p337_p13 = scmp.lt.s32.totalorder %s331_s14, %s331_s14 }
  0x1b   :  { %p338_p0 = por %p337_p13, %p336_p12 }
  0x1d   :  { %p339_p1 = pnand %p338_p0, %p332_p11 }
  0x1f   :  { %342 = shalt.err (!%p339_p1)
}
  0x20   :  { %21 = dma.hbm_to_vmem [thread:$0]  %s451_s0, 128, %s19_s21, [#allocation3]  }
  0x21   :  { %s371_s16 = smov [#allocation6]   ;;  %s343_s20 = scalar_lea.hbm %s454_s3, 1024 }
  0x22   :  { %s39_s17 = sshll.u32 %s371_s16, 4  ;;  %p344_p2 = scmp.ne.s32.totalorder %s454_s3, %s343_s20  ;;  %s40_s17 = int_to_ptr.vmem [resolvable:$true] %s39_s17 }
  0x23   :  { %p347_p3 = scmp.lt.u32.totalorder %s343_s20, %s454_s3 }
  0x25   :  { %p349_p4 = pnand %p347_p3, %p344_p2 }
  0x27   :  { %352 = shalt.err (!%p349_p4)
}
  0x28   :  { %s353_s26 = scalar_lea.vmem %s40_s17, 1024  ;;  %p358_p6 = scmp.lt.s32.totalorder %s40_s17, %s40_s17 }
  0x29   :  { %p354_p5 = scmp.ne.s32.totalorder %s40_s17, %s353_s26  ;;  %p359_p7 = scmp.lt.s32.totalorder %s353_s26, %s353_s26 }
  0x2b   :  { %p360_p8 = por %p359_p7, %p358_p6 }
  0x2d   :  { %p361_p9 = pnand %p360_p8, %p354_p5 }
  0x2f   :  { %364 = shalt.err (!%p361_p9)
}
  0x30   :  { %s372_s0 = smov 64   ;;  %s373_s21 = smov 4  }
  0x31   :  { %45 = dma.hbm_to_vmem [thread:$0]  %s454_s3, 1024, %s40_s17, [#allocation5], %s372_s0, %s372_s0, %s373_s21  }
  0x32   :  { %365 = dma.done.wait [#allocation3], 128  }
  0x33   :  { %366 = vsyncadd [#allocation3], 4294967168 }
  0x34   :  { %367 = dma.done.wait [#allocation5], 1088  }
  0x35   :  { %368 = vsyncadd [#allocation5], 4294966208  ;;  %v374_v0 = vmov 0.0   ;;  %vm375_vm0 = vmmov 0   ;;  %vm72_vm1 = vcmask 1043456   ;;  %v58_v2 = vld [vmem:[#allocation2] sm:$0xff] }
  0x36   :  { %258 = vmatprep.subr.bf16.mxu0 %v374_v0  ;;  %260 = vmatprep.mubr.msk.bf16.mxu0 %vm375_vm0, %v374_v0  ;;  %v60_v1 = vld [vmem:[#allocation4] sm:$0xf]  ;;  %v59_v4 = vpack.c.bf16 %v58_v2, %v58_v2  ;;  %v291_v5 = vld [vmem:[#allocation6] sm:$0xff]   ;;  %vm68_vm2 = vcmask 64512   ;;  %v292_v6 = vld [vmem:[#allocation6 + $0x8] sm:$0xff]  }
  0x37   :  { %264 = vmatprep.subr.bf16.mxu1 %v374_v0  ;;  %280 = vmatprep.mubr.msk.bf16.mxu1 %vm375_vm0, %v374_v0  ;;  %v74_v3 = vsel %vm72_vm1, %v60_v1, 0  ;;  %v293_v7 = vld [vmem:[#allocation6 + $0x10] sm:$0xff]   ;;  %v294_v8 = vld [vmem:[#allocation6 + $0x18] sm:$0xff]   ;;  %v295_v9 = vld [vmem:[#allocation6 + $0x20] sm:$0xff]  }
  0x38   :  { %259 = vmatpush3.bf16.msra.mxu0 %v74_v3  ;;  %265 = vmatpush3.bf16.msra.mxu1 %v291_v5  ;;  %v296_v10 = vld [vmem:[#allocation6 + $0x28] sm:$0xff]   ;;  %v297_v11 = vld [vmem:[#allocation6 + $0x30] sm:$0xff]   ;;  %v298_v12 = vld [vmem:[#allocation6 + $0x38] sm:$0xff]  }
  0x39   :  { %266 = vmatprep.subr.bf16.mxu1 %v374_v0  ;;  %v236_v13 = vld [vmem:[%s453_s2] ss:$0 sm:$0xff] }
  0x3a   :  { %v238_v21 = vld [vmem:[%s455_s4] ss:$0 sm:$0xff] }
  0x3b   :  { %261 = vmatmul.mubr.msk.bf16.vlgmr.msra.gmra.mrb[0].mxu0 %vm68_vm2, %v59_v4 }
  0x3c   :  { %267 = vmatpush3.bf16.msra.mxu1 %v292_v6 }
  0x3d   :  { %268 = vmatprep.subr.bf16.mxu1 %v374_v0 }
  0x40   :  { %269 = vmatpush3.bf16.msra.mxu1 %v293_v7 }
  0x41   :  { %270 = vmatprep.subr.bf16.mxu1 %v374_v0 }
  0x44   :  { %271 = vmatpush3.bf16.msra.mxu1 %v294_v8 }
  0x45   :  { %272 = vmatprep.subr.bf16.mxu1 %v374_v0 }
  0x48   :  { %273 = vmatpush3.bf16.msra.mxu1 %v295_v9 }
  0x49   :  { %274 = vmatprep.subr.bf16.mxu1 %v374_v0 }
  0x4c   :  { %275 = vmatpush3.bf16.msra.mxu1 %v296_v10 }
  0x4d   :  { %276 = vmatprep.subr.bf16.mxu1 %v374_v0 }
  0x50   :  { %277 = vmatpush3.bf16.msra.mxu1 %v297_v11 }
  0x51   :  { %278 = vmatprep.subr.bf16.mxu1 %v374_v0 }
  0x54   :  { %279 = vmatpush3.bf16.msra.mxu1 %v298_v12 }
 0x10e   :  { %v110_v14 = vpop.f32.mrb[0].mxu0 }
 0x10f   :  { %v111_v15 = vadd.f32 %v236_v13, %v110_v14  ;;  %v262_v16 = vpop.f32.mrb[1].mxu0 }
 0x110   :  { %v113_v17 = vpop.f32.mrb[2].mxu0 }
 0x111   :  { %v116_v18 = vmax.f32 %v111_v15, 0.0  ;;  %v263_v19 = vpop.f32.mrb[3].mxu0 }
 0x113   :  { %v117_v20 = vpack.c.bf16 %v116_v18, %v116_v18 }
 0x115   :  { %281 = vmatmul.mubr.bf16.vlgmr.msra.gmra.mrb[0].mxu1 %v117_v20 }
 0x1e8   :  { %v223_v22 = vpop.f32.mrb[0].mxu1 }
 0x1e9   :  { %v224_v23 = vadd.f32 %v238_v21, %v223_v22  ;;  %v282_v24 = vpop.f32.mrb[1].mxu1 }
 0x1ea   :  { %v226_v25 = vpop.f32.mrb[2].mxu1 }
 0x1eb   :  { %229 = vst [vmem:[%s456_s5] sm:$0xff] %v224_v23  ;;  %v283_v26 = vpop.f32.mrb[3].mxu1 }
 0x1ec   :  { %234 = vsyncpa [#allocation3], 1 }
 0x1ed   :  { %235 = vsyncpa [#allocation5], 1 }

</bundles_post_ra>
